<compile_context>
chip_gen: v7x
topology: tpu7x:2x2x1
jax: 0.10.0
libtpu: 0.0.40
codegen_flags: <defaults>
</compile_context>

<pallas_src>
import jax
import jax.numpy as jnp
from jax.experimental import pallas as pl
from jax.experimental.pallas import tpu as pltpu

IN_DIM = 512
HIDDEN = 128
OUT_DIM = 64          # output_dim passed to CLDNN_C.__init__
MAX_TILE_B = 2048     # batch-tile cap (sweepable; ~10 MiB double-buffered)


def _round_up(n, m):
    return ((n + m - 1) // m) * m


def _choose_tile_b(B):
    # Multiple of 16 (bf16 packs 16 sublanes per vreg), capped both by VMEM
    # (MAX_TILE_B) and by ~B/4 so large batches give >= 4 parallel grid steps
    # (lets v7x shard the batch axis across both TensorCores).
    t = _round_up(max(1, pl.cdiv(B, 4)), 16)
    return max(16, min(MAX_TILE_B, t))


def mlp_kernel(x_ref, w1_ref, b1_ref, w2_ref, b2_ref, o_ref):
    # fc1 + ReLU: cast the f32 tile to bf16 in-kernel (fused with the DMA'd
    # tile, no standalone cast op), accumulate in f32 on the MXU.
    x = x_ref[...].astype(jnp.bfloat16)
    w1 = w1_ref[...].astype(jnp.bfloat16)
    h = jnp.dot(x, w1, preferred_element_type=jnp.float32)
    h = jnp.maximum(h + b1_ref[...], 0.0)
    # fc2: hidden back to bf16 for the second bf16 MXU pass; output stays f32.
    w2 = w2_ref[...].astype(jnp.bfloat16)
    y = jnp.dot(h.astype(jnp.bfloat16), w2, preferred_element_type=jnp.float32)
    o_ref[...] = (y + b2_ref[...]).astype(o_ref.dtype)


@jax.jit
def cldnn_c_forward(x, w1, b1, w2, b2):
    """y = relu(x @ w1 + b1) @ w2 + b2 (weights stored (in, out), all f32)."""
    B = x.shape[0]
    tile_b = _choose_tile_b(B)
    grid = (pl.cdiv(B, tile_b),)

    return pl.pallas_call(
        mlp_kernel,
        out_shape=jax.ShapeDtypeStruct((B, OUT_DIM), jnp.float32),
        grid_spec=pl.GridSpec(
            grid=grid,
            in_specs=[
                pl.BlockSpec((tile_b, IN_DIM), lambda i: (i, 0)),
                pl.BlockSpec((IN_DIM, HIDDEN), lambda i: (0, 0)),
                pl.BlockSpec((1, HIDDEN), lambda i: (0, 0)),
                pl.BlockSpec((HIDDEN, OUT_DIM), lambda i: (0, 0)),
                pl.BlockSpec((1, OUT_DIM), lambda i: (0, 0)),
            ],
            out_specs=pl.BlockSpec((tile_b, OUT_DIM), lambda i: (i, 0)),
        ),
        compiler_params=pltpu.CompilerParams(
            dimension_semantics=("parallel",),
            # Generation-aware headroom: well under v7x's 64 MiB physical
            # VMEM, above v5e's 16 MiB default scoped limit.
            vmem_limit_bytes=48 * 1024 * 1024,
        ),
    )(x, w1, b1, w2, b2)


def init_params(key):
    # Deterministic init mimicking PyTorch nn.Linear default:
    # U(-1/sqrt(fan_in), 1/sqrt(fan_in)) for weight and bias.
    k1, k2, k3, k4 = jax.random.split(key, 4)
    bound1 = 1.0 / (IN_DIM ** 0.5)
    bound2 = 1.0 / (HIDDEN ** 0.5)
    # Stored already transposed: (in_features, out_features).
    w1 = jax.random.uniform(k1, (IN_DIM, HIDDEN), jnp.float32, -bound1, bound1)
    b1 = jax.random.uniform(k2, (1, HIDDEN), jnp.float32, -bound1, bound1)
    w2 = jax.random.uniform(k3, (HIDDEN, OUT_DIM), jnp.float32, -bound2, bound2)
    b2 = jax.random.uniform(k4, (1, OUT_DIM), jnp.float32, -bound2, bound2)
    return w1, b1, w2, b2


if __name__ == "__main__":
    key = jax.random.PRNGKey(0)
    kx, kp = jax.random.split(key)

    B = 8
    x = jax.random.normal(kx, (B, IN_DIM), jnp.float32)
    w1, b1, w2, b2 = init_params(kp)

    out = cldnn_c_forward(x, w1, b1, w2, b2)
    out = jax.block_until_ready(out)

    # Pure-JAX reference with the same bf16 rounding / f32 accumulation.
    xb = x.astype(jnp.bfloat16).astype(jnp.float32)
    w1b = w1.astype(jnp.bfloat16).astype(jnp.float32)
    w2b = w2.astype(jnp.bfloat16).astype(jnp.float32)
    h_ref = jnp.maximum(xb @ w1b + b1, 0.0)
    h_ref = h_ref.astype(jnp.bfloat16).astype(jnp.float32)
    ref = h_ref @ w2b + b2

    assert out.shape == (B, OUT_DIM)
    assert jnp.allclose(out, ref, atol=2e-3, rtol=2e-3)

    print("KERNEL_OK")
</pallas_src>

<mosaic_0001>
module attributes {stable_mosaic.version = 11 : i64} {
  func.func @mlp_kernel(%arg0: i32, %arg1: memref<16x512xf32, #tpu.memory_space<vmem>>, %arg2: memref<512x128xf32, #tpu.memory_space<vmem>>, %arg3: memref<1x128xf32, #tpu.memory_space<vmem>>, %arg4: memref<128x64xf32, #tpu.memory_space<vmem>>, %arg5: memref<1x64xf32, #tpu.memory_space<vmem>>, %arg6: memref<16x64xf32, #tpu.memory_space<vmem>>) attributes {dimension_semantics = [#tpu.dimension_semantics<parallel>], iteration_bounds = array<i64: 1>, scalar_prefetch = 0 : i64, scratch_operands = 0 : i64, tpu.core_type = #tpu.core_type<tc>, window_params = [{transform_indices = @transform_0, window_bounds = array<i64: 16, 512>}, {pipeline_mode = #tpu.pipeline_mode<synchronous>, transform_indices = @transform_1, window_bounds = array<i64: 512, 128>}, {pipeline_mode = #tpu.pipeline_mode<synchronous>, transform_indices = @transform_2, window_bounds = array<i64: 1, 128>}, {pipeline_mode = #tpu.pipeline_mode<synchronous>, transform_indices = @transform_3, window_bounds = array<i64: 128, 64>}, {pipeline_mode = #tpu.pipeline_mode<synchronous>, transform_indices = @transform_4, window_bounds = array<i64: 1, 64>}, {transform_indices = @transform_5, window_bounds = array<i64: 16, 64>}]} {
    %c0 = arith.constant 0 : index
    %c0_0 = arith.constant 0 : index
    %0 = vector.load %arg1[%c0, %c0_0] : memref<16x512xf32, #tpu.memory_space<vmem>>, vector<16x512xf32>
    %1 = arith.truncf %0 : vector<16x512xf32> to vector<16x512xbf16>
    %c0_1 = arith.constant 0 : index
    %c0_2 = arith.constant 0 : index
    %2 = vector.load %arg2[%c0_1, %c0_2] : memref<512x128xf32, #tpu.memory_space<vmem>>, vector<512x128xf32>
    %3 = arith.truncf %2 : vector<512x128xf32> to vector<512x128xbf16>
    %cst = arith.constant dense<0.000000e+00> : vector<16x128xf32>
    %4 = tpu.matmul %1, %3, %cst {dimension_numbers = #tpu.dot_dimension_numbers<[1], [0], [0], [1], [0, 0, 1, 1], [], []>} : vector<16x512xbf16>, vector<512x128xbf16>, vector<16x128xf32> -> vector<16x128xf32>
    %c0_3 = arith.constant 0 : index
    %c0_4 = arith.constant 0 : index
    %5 = vector.load %arg3[%c0_3, %c0_4] : memref<1x128xf32, #tpu.memory_space<vmem>>, vector<1x128xf32>
    %6 = vector.broadcast %5 : vector<1x128xf32> to vector<16x128xf32>
    %7 = arith.addf %4, %6 : vector<16x128xf32>
    %cst_5 = arith.constant 0.000000e+00 : f32
    %8 = vector.broadcast %cst_5 : f32 to vector<16x128xf32>
    %9 = arith.maximumf %7, %8 : vector<16x128xf32>
    %c0_6 = arith.constant 0 : index
    %c0_7 = arith.constant 0 : index
    %10 = vector.load %arg4[%c0_6, %c0_7] : memref<128x64xf32, #tpu.memory_space<vmem>>, vector<128x64xf32>
    %11 = arith.truncf %10 : vector<128x64xf32> to vector<128x64xbf16>
    %12 = arith.truncf %9 : vector<16x128xf32> to vector<16x128xbf16>
    %cst_8 = arith.constant dense<0.000000e+00> : vector<16x64xf32>
    %13 = tpu.matmul %12, %11, %cst_8 {dimension_numbers = #tpu.dot_dimension_numbers<[1], [0], [0], [1], [0, 0, 1, 1], [], []>} : vector<16x128xbf16>, vector<128x64xbf16>, vector<16x64xf32> -> vector<16x64xf32>
    %c0_9 = arith.constant 0 : index
    %c0_10 = arith.constant 0 : index
    %14 = vector.load %arg5[%c0_9, %c0_10] : memref<1x64xf32, #tpu.memory_space<vmem>>, vector<1x64xf32>
    %15 = vector.broadcast %14 : vector<1x64xf32> to vector<16x64xf32>
    %16 = arith.addf %13, %15 : vector<16x64xf32>
    %c0_11 = arith.constant 0 : index
    %c0_12 = arith.constant 0 : index
    %17 = vector.load %arg6[%c0_11, %c0_12] : memref<16x64xf32, #tpu.memory_space<vmem>>, vector<16x64xf32>
    tpu.vector_store %arg6[%c0_11, %c0_12], %16 {strides = array<i32>} : memref<16x64xf32, #tpu.memory_space<vmem>>, vector<16x64xf32>,
    return
  }
  func.func @transform_0(%arg0: i32) -> (i32, i32) {
    %c0_i32 = arith.constant 0 : i32
    %c0_i32_0 = arith.constant 0 : i32
    return %arg0, %c0_i32 : i32, i32
  }
  func.func @transform_1(%arg0: i32) -> (i32, i32) {
    %c0_i32 = arith.constant 0 : i32
    %c0_i32_0 = arith.constant 0 : i32
    %c0_i32_1 = arith.constant 0 : i32
    return %c0_i32, %c0_i32_0 : i32, i32
  }
  func.func @transform_2(%arg0: i32) -> (i32, i32) {
    %c0_i32 = arith.constant 0 : i32
    %c0_i32_0 = arith.constant 0 : i32
    %c0_i32_1 = arith.constant 0 : i32
    return %c0_i32, %c0_i32_0 : i32, i32
  }
  func.func @transform_3(%arg0: i32) -> (i32, i32) {
    %c0_i32 = arith.constant 0 : i32
    %c0_i32_0 = arith.constant 0 : i32
    %c0_i32_1 = arith.constant 0 : i32
    return %c0_i32, %c0_i32_0 : i32, i32
  }
  func.func @transform_4(%arg0: i32) -> (i32, i32) {
    %c0_i32 = arith.constant 0 : i32
    %c0_i32_0 = arith.constant 0 : i32
    %c0_i32_1 = arith.constant 0 : i32
    return %c0_i32, %c0_i32_0 : i32, i32
  }
  func.func @transform_5(%arg0: i32) -> (i32, i32) {
    %c0_i32 = arith.constant 0 : i32
    %c0_i32_0 = arith.constant 0 : i32
    return %arg0, %c0_i32 : i32, i32
  }
}

</mosaic_0001>

<bundles_post_ra>
// kernel: cldnn_c_forward.1
= control target key start
LH: loop header
LB: loop body
LE: loop exit
PB: predicated region body
PF: predicated region fallthrough
CT: control target
= control target key end

     0   :  { %10 = vsyncpa [#allocation3], 0  ;;  %s601_s0 = inlined_call_operand.vmem [shape: f32[8,512], index: 0, kind: input, shape index: {}]   ;;  %s602_s1 = inlined_call_operand.hbm [shape: f32[512,128], index: 1, kind: input, shape index: {}]   ;;  %s603_s2 = inlined_call_operand.vmem [shape: f32[1,128], index: 2, kind: input, shape index: {}]   ;;  %s604_s3 = inlined_call_operand.vmem [shape: f32[128,64], index: 3, kind: input, shape index: {}]   ;;  %s605_s4 = inlined_call_operand.vmem [shape: f32[1,64], index: 4, kind: input, shape index: {}]   ;;  %s606_s5 = inlined_call_operand.hbm [shape: f32[8,64], index: 5, kind: output, shape index: {}]  }
   0x1   :  { %11 = vsyncpa [#allocation4], 0  ;;  %s457_s18 = smov [#allocation2]   ;;  %s409_s22 = scalar_lea.hbm %s602_s1, 8192 }
   0x2   :  { %s19_s19 = sshll.u32 %s457_s18, 4  ;;  %p410_p0 = scmp.ne.s32.totalorder %s602_s1, %s409_s22  ;;  %s20_s19 = int_to_ptr.vmem [resolvable:$true] %s19_s19 }
   0x3   :  { %p413_p1 = scmp.lt.u32.totalorder %s409_s22, %s602_s1 }
   0x5   :  { %p415_p2 = pnand %p413_p1, %p410_p0 }
   0x7   :  { %418 = shalt.err (!%p415_p2)
}
   0x8   :  { %s419_s27 = scalar_lea.vmem %s20_s19, 8192  ;;  %p424_p4 = scmp.lt.s32.totalorder %s20_s19, %s20_s19 }
   0x9   :  { %p420_p3 = scmp.ne.s32.totalorder %s20_s19, %s419_s27  ;;  %p425_p5 = scmp.lt.s32.totalorder %s419_s27, %s419_s27 }
   0xb   :  { %p426_p6 = por %p425_p5, %p424_p4 }
   0xd   :  { %p427_p7 = pnand %p426_p6, %p420_p3 }
   0xf   :  { %430 = shalt.err (!%p427_p7)
}
  0x10   :  { %s458_s28 = smov 128   ;;  %s459_s29 = smov 8  }
  0x11   :  { %25 = dma.hbm_to_vmem [thread:$0]  %s602_s1, 8192, %s20_s19, [#allocation3], %s458_s28, %s458_s28, %s459_s29  }
  0x12   :  { %453 = dma.done.wait [#allocation3], 8192  }
  0x13   :  { %454 = vsyncadd [#allocation3], 4294959104  ;;  %v64_v0 = vld [vmem:[#allocation2 + $0x80] sm:$0xff]  ;;  %v65_v1 = vld [vmem:[#allocation2 + $0x88] sm:$0xff]  ;;  %vm461_vm0 = vmmov 0   ;;  %vm308_vm1 = vcmask 523264  }
  0x14   :  { %v96_v2 = vld [vmem:[#allocation2 + $0x180] sm:$0xff]  ;;  %v120_v3 = vpack.c.bf16 %v65_v1, %v64_v0  ;;  %v97_v4 = vld [vmem:[#allocation2 + $0x188] sm:$0xff]  ;;  %v66_v11 = vld [vmem:[#allocation2 + $0x90] sm:$0xff] }
  0x15   :  { %v48_v5 = vld [vmem:[#allocation2] sm:$0xff]  ;;  %v49_v6 = vld [vmem:[#allocation2 + $0x8] sm:$0xff]  ;;  %v136_v7 = vpack.c.bf16 %v97_v4, %v96_v2  ;;  %v67_v13 = vld [vmem:[#allocation2 + $0x98] sm:$0xff] }
  0x16   :  { %v112_v8 = vpack.c.bf16 %v49_v6, %v48_v5  ;;  %v80_v9 = vld [vmem:[#allocation2 + $0x100] sm:$0xff]  ;;  %v81_v10 = vld [vmem:[#allocation2 + $0x108] sm:$0xff]  ;;  %330 = vmatprep.subr.bf16.mxu0 %v120_v3  ;;  %v98_v14 = vld [vmem:[#allocation2 + $0x190] sm:$0xff]  ;;  %v121_v16 = vpack.c.bf16 %v67_v13, %v66_v11 }
  0x17   :  { %v128_v12 = vpack.c.bf16 %v81_v10, %v80_v9  ;;  %v99_v15 = vld [vmem:[#allocation2 + $0x198] sm:$0xff]  ;;  %352 = vmatprep.subr.bf16.mxu1 %v136_v7  ;;  %v50_v18 = vld [vmem:[#allocation2 + $0x10] sm:$0xff]  ;;  %v68_v23 = vld [vmem:[#allocation2 + $0xa0] sm:$0xff] }
  0x18   :  { %331 = vmatpush3.bf16.msra.mxu0 %v112_v8  ;;  %v137_v17 = vpack.c.bf16 %v99_v15, %v98_v14  ;;  %v51_v19 = vld [vmem:[#allocation2 + $0x18] sm:$0xff]  ;;  %v82_v20 = vld [vmem:[#allocation2 + $0x110] sm:$0xff]  ;;  %v69_v24 = vld [vmem:[#allocation2 + $0xa8] sm:$0xff] }
  0x19   :  { %353 = vmatpush3.bf16.msra.mxu1 %v128_v12  ;;  %v113_v21 = vpack.c.bf16 %v51_v19, %v50_v18  ;;  %v83_v22 = vld [vmem:[#allocation2 + $0x118] sm:$0xff]  ;;  %332 = vmatprep.subr.bf16.mxu0 %v121_v16  ;;  %v122_v26 = vpack.c.bf16 %v69_v24, %v68_v23  ;;  %v100_v27 = vld [vmem:[#allocation2 + $0x1a0] sm:$0xff]  ;;  %v101_v28 = vld [vmem:[#allocation2 + $0x1a8] sm:$0xff] }
  0x1a   :  { %354 = vmatprep.subr.bf16.mxu1 %v137_v17  ;;  %v129_v25 = vpack.c.bf16 %v83_v22, %v82_v20  ;;  %v52_v29 = vld [vmem:[#allocation2 + $0x20] sm:$0xff]  ;;  %v138_v30 = vpack.c.bf16 %v101_v28, %v100_v27  ;;  %v53_v31 = vld [vmem:[#allocation2 + $0x28] sm:$0xff]  ;;  %v70_v35 = vld [vmem:[#allocation2 + $0xb0] sm:$0xff] }
  0x1b   :  { %v84_v32 = vld [vmem:[#allocation2 + $0x120] sm:$0xff]  ;;  %v85_v33 = vld [vmem:[#allocation2 + $0x128] sm:$0xff]  ;;  %v114_v34 = vpack.c.bf16 %v53_v31, %v52_v29  ;;  %v71_v36 = vld [vmem:[#allocation2 + $0xb8] sm:$0xff] }
  0x1c   :  { %333 = vmatpush3.bf16.msra.mxu0 %v113_v21  ;;  %v102_v37 = vld [vmem:[#allocation2 + $0x1b0] sm:$0xff]  ;;  %v130_v38 = vpack.c.bf16 %v85_v33, %v84_v32  ;;  %v123_v39 = vpack.c.bf16 %v71_v36, %v70_v35  ;;  %v103_v40 = vld [vmem:[#allocation2 + $0x1b8] sm:$0xff]  ;;  %v72_v46 = vld [vmem:[#allocation2 + $0xc0] sm:$0xff] }
  0x1d   :  { %355 = vmatpush3.bf16.msra.mxu1 %v129_v25  ;;  %334 = vmatprep.subr.bf16.mxu0 %v122_v26  ;;  %v54_v41 = vld [vmem:[#allocation2 + $0x30] sm:$0xff]  ;;  %v55_v42 = vld [vmem:[#allocation2 + $0x38] sm:$0xff]  ;;  %v139_v43 = vpack.c.bf16 %v103_v40, %v102_v37  ;;  %v73_v47 = vld [vmem:[#allocation2 + $0xc8] sm:$0xff] }
  0x1e   :  { %356 = vmatprep.subr.bf16.mxu1 %v138_v30  ;;  %v86_v44 = vld [vmem:[#allocation2 + $0x130] sm:$0xff]  ;;  %v87_v45 = vld [vmem:[#allocation2 + $0x138] sm:$0xff]  ;;  %v104_v48 = vld [vmem:[#allocation2 + $0x1c0] sm:$0xff]  ;;  %v115_v50 = vpack.c.bf16 %v55_v42, %v54_v41  ;;  %v124_v52 = vpack.c.bf16 %v73_v47, %v72_v46  ;;  %v460_v47 = vmov 0.0  }
  0x1f   :  { %v105_v49 = vld [vmem:[#allocation2 + $0x1c8] sm:$0xff]  ;;  %v131_v51 = vpack.c.bf16 %v87_v45, %v86_v44  ;;  %v56_v53 = vld [vmem:[#allocation2 + $0x40] sm:$0xff]  ;;  %v74_v58 = vld [vmem:[#allocation2 + $0xd0] sm:$0xff] }
  0x20   :  { %335 = vmatpush3.bf16.msra.mxu0 %v114_v34  ;;  %v57_v54 = vld [vmem:[#allocation2 + $0x48] sm:$0xff]  ;;  %v88_v55 = vld [vmem:[#allocation2 + $0x140] sm:$0xff]  ;;  %v140_v56 = vpack.c.bf16 %v105_v49, %v104_v48  ;;  %v75_v59 = vld [vmem:[#allocation2 + $0xd8] sm:$0xff] }
  0x21   :  { %357 = vmatpush3.bf16.msra.mxu1 %v130_v38  ;;  %336 = vmatprep.subr.bf16.mxu0 %v123_v39  ;;  %v89_v57 = vld [vmem:[#allocation2 + $0x148] sm:$0xff]  ;;  %v106_v60 = vld [vmem:[#allocation2 + $0x1d0] sm:$0xff]  ;;  %v107_v61 = vld [vmem:[#allocation2 + $0x1d8] sm:$0xff]  ;;  %v116_v62 = vpack.c.bf16 %v57_v54, %v56_v53  ;;  %v125_v0 = vpack.c.bf16 %v75_v59, %v74_v58 }
  0x22   :  { %358 = vmatprep.subr.bf16.mxu1 %v139_v43  ;;  %v132_v63 = vpack.c.bf16 %v89_v57, %v88_v55  ;;  %v58_v1 = vld [vmem:[#allocation2 + $0x50] sm:$0xff]  ;;  %v59_v2 = vld [vmem:[#allocation2 + $0x58] sm:$0xff]  ;;  %v141_v4 = vpack.c.bf16 %v107_v61, %v106_v60  ;;  %v76_v6 = vld [vmem:[#allocation2 + $0xe0] sm:$0xff] }
  0x23   :  { %v90_v3 = vld [vmem:[#allocation2 + $0x150] sm:$0xff]  ;;  %v91_v5 = vld [vmem:[#allocation2 + $0x158] sm:$0xff]  ;;  %v77_v7 = vld [vmem:[#allocation2 + $0xe8] sm:$0xff]  ;;  %v117_v11 = vpack.c.bf16 %v59_v2, %v58_v1 }
  0x24   :  { %337 = vmatpush3.bf16.msra.mxu0 %v115_v50  ;;  %v108_v8 = vld [vmem:[#allocation2 + $0x1e0] sm:$0xff]  ;;  %v109_v9 = vld [vmem:[#allocation2 + $0x1e8] sm:$0xff]  ;;  %v133_v15 = vpack.c.bf16 %v91_v5, %v90_v3  ;;  %v126_v16 = vpack.c.bf16 %v77_v7, %v76_v6  ;;  %v78_v17 = vld [vmem:[#allocation2 + $0xf0] sm:$0xff] }
  0x25   :  { %359 = vmatpush3.bf16.msra.mxu1 %v131_v51  ;;  %338 = vmatprep.subr.bf16.mxu0 %v124_v52  ;;  %v60_v10 = vld [vmem:[#allocation2 + $0x60] sm:$0xff]  ;;  %v61_v12 = vld [vmem:[#allocation2 + $0x68] sm:$0xff]  ;;  %v142_v20 = vpack.c.bf16 %v109_v9, %v108_v8  ;;  %v79_v21 = vld [vmem:[#allocation2 + $0xf8] sm:$0xff] }
  0x26   :  { %360 = vmatprep.subr.bf16.mxu1 %v140_v56  ;;  %v92_v13 = vld [vmem:[#allocation2 + $0x160] sm:$0xff]  ;;  %v93_v14 = vld [vmem:[#allocation2 + $0x168] sm:$0xff]  ;;  %v39_v23 = vld [vmem:[%s601_s0 + $0x18] sm:$0xff]  ;;  %v118_v28 = vpack.c.bf16 %v61_v12, %v60_v10  ;;  %v127_v30 = vpack.c.bf16 %v79_v21, %v78_v17 }
  0x27   :  { %v37_v18 = vld [vmem:[%s601_s0 + $0x8] sm:$0xff]  ;;  %v43_v24 = vld [vmem:[%s601_s0 + $0x38] sm:$0xff]  ;;  %v110_v25 = vld [vmem:[#allocation2 + $0x1f0] sm:$0xff]  ;;  %v134_v29 = vpack.c.bf16 %v93_v14, %v92_v13 }
  0x28   :  { %339 = vmatpush3.bf16.msra.mxu0 %v116_v62  ;;  %v41_v19 = vld [vmem:[%s601_s0 + $0x28] sm:$0xff]  ;;  %v111_v26 = vld [vmem:[#allocation2 + $0x1f8] sm:$0xff]  ;;  %v47_v27 = vpack.c.bf16 %v43_v24, %v39_v23  ;;  %v62_v31 = vld [vmem:[#allocation2 + $0x70] sm:$0xff] }
  0x29   :  { %361 = vmatpush3.bf16.msra.mxu1 %v132_v63  ;;  %340 = vmatprep.subr.bf16.mxu0 %v125_v0  ;;  %v45_v22 = vpack.c.bf16 %v41_v19, %v37_v18  ;;  %v63_v32 = vld [vmem:[#allocation2 + $0x78] sm:$0xff]  ;;  %v143_v33 = vpack.c.bf16 %v111_v26, %v110_v25  ;;  %v94_v34 = vld [vmem:[#allocation2 + $0x170] sm:$0xff]  ;;  %v36_v37 = vld [vmem:[%s601_s0] sm:$0xff] }
  0x2a   :  { %362 = vmatprep.subr.bf16.mxu1 %v141_v4  ;;  %v95_v35 = vld [vmem:[#allocation2 + $0x178] sm:$0xff]  ;;  %224 = vmatprep.mubr.bf16.mxu1 %v47_v27  ;;  %v119_v36 = vpack.c.bf16 %v63_v32, %v62_v31  ;;  %v40_v38 = vld [vmem:[%s601_s0 + $0x20] sm:$0xff]  ;;  %v38_v39 = vld [vmem:[%s601_s0 + $0x10] sm:$0xff] }
  0x2b   :  { %183 = vmatprep.mubr.bf16.mxu0 %v45_v22  ;;  %v135_v40 = vpack.c.bf16 %v95_v35, %v94_v34  ;;  %v42_v41 = vld [vmem:[%s601_s0 + $0x30] sm:$0xff]  ;;  %v235_v42 = vld [vmem:[%s604_s3] sm:$0xff]  ;;  %v236_v43 = vld [vmem:[%s604_s3 + $0x8] sm:$0xff]  ;;  %v44_v44 = vpack.c.bf16 %v40_v38, %v36_v37 }
  0x2c   :  { %341 = vmatpush3.bf16.msra.mxu0 %v117_v11  ;;  %v46_v45 = vpack.c.bf16 %v42_v41, %v38_v39  ;;  %v251_v46 = vpack.c.bf16 %v236_v43, %v235_v42  ;;  %v237_v48 = vld [vmem:[%s604_s3 + $0x10] sm:$0xff]  ;;  %v238_v49 = vld [vmem:[%s604_s3 + $0x18] sm:$0xff]  ;;  %v239_v51 = vld [vmem:[%s604_s3 + $0x20] sm:$0xff] }
  0x2d   :  { %363 = vmatpush3.bf16.msra.mxu1 %v133_v15  ;;  %342 = vmatprep.subr.bf16.mxu0 %v126_v16  ;;  %v252_v50 = vpack.c.bf16 %v238_v49, %v237_v48  ;;  %v240_v52 = vld [vmem:[%s604_s3 + $0x28] sm:$0xff]  ;;  %v241_v54 = vld [vmem:[%s604_s3 + $0x30] sm:$0xff]  ;;  %v242_v55 = vld [vmem:[%s604_s3 + $0x38] sm:$0xff] }
  0x2e   :  { %364 = vmatprep.subr.bf16.mxu1 %v142_v20  ;;  %v253_v53 = vpack.c.bf16 %v240_v52, %v239_v51  ;;  %v254_v56 = vpack.c.bf16 %v242_v55, %v241_v54  ;;  %v243_v57 = vld [vmem:[%s604_s3 + $0x40] sm:$0xff]  ;;  %v244_v58 = vld [vmem:[%s604_s3 + $0x48] sm:$0xff]  ;;  %v245_v60 = vld [vmem:[%s604_s3 + $0x50] sm:$0xff] }
  0x2f   :  { %v255_v59 = vpack.c.bf16 %v244_v58, %v243_v57  ;;  %v246_v61 = vld [vmem:[%s604_s3 + $0x58] sm:$0xff]  ;;  %v247_v63 = vld [vmem:[%s604_s3 + $0x60] sm:$0xff]  ;;  %v248_v0 = vld [vmem:[%s604_s3 + $0x68] sm:$0xff] }
  0x30   :  { %343 = vmatpush3.bf16.msra.mxu0 %v118_v28  ;;  %v256_v62 = vpack.c.bf16 %v246_v61, %v245_v60  ;;  %v257_v1 = vpack.c.bf16 %v248_v0, %v247_v63  ;;  %v249_v2 = vld [vmem:[%s604_s3 + $0x70] sm:$0xff]  ;;  %v250_v3 = vld [vmem:[%s604_s3 + $0x78] sm:$0xff]  ;;  %v328_v7 = vld [vmem:[%s603_s2] ss:$0 sm:$0xff] }
  0x31   :  { %365 = vmatpush3.bf16.msra.mxu1 %v134_v29  ;;  %344 = vmatprep.subr.bf16.mxu0 %v127_v30  ;;  %v258_v4 = vpack.c.bf16 %v250_v3, %v249_v2  ;;  %v329_v25 = vld [vmem:[%s605_s4] ss:$0 sm:$0xff] }
  0x32   :  { %366 = vmatprep.subr.bf16.mxu1 %v143_v33 }
  0x34   :  { %345 = vmatpush3.bf16.msra.mxu0 %v119_v36 }
  0x35   :  { %367 = vmatpush3.bf16.msra.mxu1 %v135_v40  ;;  %383 = vmatprep.subr.bf16.mxu0 %v460_v47 }
  0x37   :  { %184 = vmatmul.mubr.bf16.vlgmr.msra.gmra.mrb[0].mxu0 %v44_v44 }
  0x38   :  { %225 = vmatmul.mubr.bf16.vlgmr.msra.gmra.mrb[0].mxu1 %v46_v45  ;;  %384 = vmatpush3.bf16.msra.mxu0 %v251_v46 }
  0x39   :  { %385 = vmatprep.subr.bf16.mxu0 %v460_v47  ;;  %399 = vmatprep.mubr.msk.bf16.mxu0 %vm461_vm0, %v460_v47 }
  0x3c   :  { %386 = vmatpush3.bf16.msra.mxu0 %v252_v50 }
  0x3d   :  { %387 = vmatprep.subr.bf16.mxu0 %v460_v47 }
  0x40   :  { %388 = vmatpush3.bf16.msra.mxu0 %v253_v53 }
  0x41   :  { %389 = vmatprep.subr.bf16.mxu0 %v460_v47 }
  0x44   :  { %390 = vmatpush3.bf16.msra.mxu0 %v254_v56 }
  0x45   :  { %391 = vmatprep.subr.bf16.mxu0 %v460_v47 }
  0x48   :  { %392 = vmatpush3.bf16.msra.mxu0 %v255_v59 }
  0x49   :  { %393 = vmatprep.subr.bf16.mxu0 %v460_v47 }
  0x4c   :  { %394 = vmatpush3.bf16.msra.mxu0 %v256_v62 }
  0x4d   :  { %395 = vmatprep.subr.bf16.mxu0 %v460_v47 }
  0x50   :  { %396 = vmatpush3.bf16.msra.mxu0 %v257_v1 }
  0x51   :  { %397 = vmatprep.subr.bf16.mxu0 %v460_v47 }
  0x54   :  { %398 = vmatpush3.bf16.msra.mxu0 %v258_v4 }
 0x10a   :  { %v346_v5 = vpop.f32.mrb[0].mxu0 }
 0x10b   :  { %v368_v6 = vpop.f32.mrb[0].mxu1  ;;  %v347_v8 = vpop.f32.mrb[1].mxu0 }
 0x10c   :  { %v348_v9 = vadd.f32 %v347_v8, %v346_v5  ;;  %v369_v10 = vpop.f32.mrb[1].mxu1  ;;  %v349_v11 = vpop.f32.mrb[2].mxu0 }
 0x10d   :  { %v370_v12 = vadd.f32 %v369_v10, %v368_v6  ;;  %v371_v13 = vpop.f32.mrb[2].mxu1  ;;  %v350_v14 = vpop.f32.mrb[3].mxu0 }
 0x10e   :  { %v186_v15 = vadd.f32 %v348_v9, %v328_v7  ;;  %v351_v16 = vadd.f32 %v350_v14, %v349_v11  ;;  %v372_v17 = vpop.f32.mrb[3].mxu1 }
 0x10f   :  { %v373_v18 = vadd.f32 %v372_v17, %v371_v13 }
 0x110   :  { %v227_v19 = vadd.f32 %v370_v12, %v186_v15  ;;  %v189_v20 = vadd.f32 %v351_v16, %v328_v7 }
 0x112   :  { %v230_v21 = vadd.f32 %v373_v18, %v189_v20  ;;  %v233_v22 = vmax.f32 %v227_v19, 0.0 }
 0x114   :  { %v234_v23 = vmax.f32 %v230_v21, 0.0 }
 0x116   :  { %v259_v24 = vpack.c.bf16 %v234_v23, %v233_v22 }
 0x118   :  { %400 = vmatmul.mubr.bf16.vlgmr.msra.gmra.mrb[4].mxu0 %v259_v24 }
 0x1eb   :  { %v301_v26 = vpop.f32.mrb[4].mxu0 }
 0x1ec   :  { %v302_v27 = vadd.f32 %v329_v25, %v301_v26  ;;  %v401_v28 = vpop.f32.mrb[5].mxu0 }
 0x1ed   :  { %v304_v29 = vpop.f32.mrb[6].mxu0 }
 0x1ee   :  { %309 = vst.msk [vmem:[#allocation5] sm:$0xff] %vm308_vm1, %v302_v27  ;;  %v305_v30 = vadd.f32 %v329_v25, %v304_v29  ;;  %v402_v31 = vpop.f32.mrb[7].mxu0 }
 0x1f0   :  { %310 = vst.msk [vmem:[#allocation5 + $0x8] sm:$0xff] %vm308_vm1, %v305_v30 }
 0x1f1   :  { %315 = vsyncadd [#allocation4], 128  ;;  %s462_s1 = smov [#allocation5]  }
 0x1f2   :  { %s316_s7 = sshll.u32 %s462_s1, 4  ;;  %s317_s7 = int_to_ptr.vmem [resolvable:$true] %s316_s7 }
 0x1f3   :  { %s431_s8 = scalar_lea.vmem %s317_s7, 128  ;;  %s435_s9 = scalar_lea.vmem %s317_s7, 256 }
 0x1f4   :  { %p432_p8 = scmp.ne.s32.totalorder %s317_s7, %s431_s8  ;;  %p436_p9 = scmp.lt.s32.totalorder %s317_s7, %s317_s7 }
 0x1f5   :  { %p437_p10 = scmp.lt.s32.totalorder %s435_s9, %s431_s8 }
 0x1f7   :  { %p438_p11 = por %p437_p10, %p436_p9 }
 0x1f9   :  { %p439_p12 = pnand %p438_p11, %p432_p8 }
 0x1fb   :  { %442 = shalt.err (!%p439_p12)
}
 0x1fc   :  { %s443_s11 = scalar_lea.hbm %s606_s5, 128 }
 0x1fd   :  { %p444_p13 = scmp.ne.s32.totalorder %s606_s5, %s443_s11  ;;  %p447_p0 = scmp.lt.u32.totalorder %s443_s11, %s606_s5 }
 0x1ff   :  { %p449_p1 = pnand %p447_p0, %p444_p13 }
 0x201   :  { %452 = shalt.err (!%p449_p1)
}
 0x202   :  { %322 = dma.vmem_to_hbm [thread:$0]  %s317_s7, 128, %s606_s5, [#allocation4], %s458_s28, %s458_s28, %s459_s29  }
 0x203   :  { %455 = dma.done.wait [#allocation4], 256  }
 0x204   :  { %456 = vsyncadd [#allocation4], 4294967040 }
 0x205   :  { %326 = vsyncpa [#allocation3], 1 }
 0x206   :  { %327 = vsyncpa [#allocation4], 1 }

</bundles_post_ra>
